<compile_context>
chip_gen: v5e
topology: v5e:2x2
jax: 0.10.0
libtpu: 0.0.40
codegen_flags: <defaults>
</compile_context>

<pallas_src>
import functools

import jax
import jax.numpy as jnp
from jax.experimental import pallas as pl
from jax.experimental.pallas import tpu as pltpu


def _sigmoid_via_tanh(x):
    # One EUP push (tanh) instead of exp + divide per sigmoid.
    return 0.5 * jnp.tanh(0.5 * x) + 0.5


def lstm_recurrent_kernel(gx_ref, w_hh_ref, h_out_ref, h_sc, c_sc, *,
                          t_valid, needs_mask, inner_unroll):
    """Recurrent part only.

    gx_ref:   (TU, Bblk, 4H) bf16  precomputed x_t @ W_ih + (b_ih + b_hh)
    w_hh_ref: (H, 4H)        bf16  recurrent weights (right-multiply layout)
    h_out_ref:(Bblk, H)      f32   h at the final (valid) timestep
    h_sc/c_sc:(Bblk, H)      f32   carried hidden / cell state
    """
    t_blk = pl.program_id(1)
    nt = pl.num_programs(1)
    tu = gx_ref.shape[0]
    H = h_sc.shape[-1]

    # h0 = c0 = 0 (PyTorch default); reset at the start of each batch block's
    # time sweep.
    @pl.when(t_blk == 0)
    def _():
        h_sc[...] = jnp.zeros_like(h_sc)
        c_sc[...] = jnp.zeros_like(c_sc)

    w_hh = w_hh_ref[...]          # loop-invariant, bf16
    t0 = t_blk * tu               # global index of this block's first timestep

    def step(u, carry):
        h_prev, c_prev = carry
        # gx already contains x_t @ W_ih + bias; only the recurrent matmul
        # remains per step.  bf16 operands, f32 accumulation, f32 gate math.
        gates = (gx_ref[u].astype(jnp.float32)
                 + jnp.dot(h_prev.astype(w_hh.dtype), w_hh,
                           preferred_element_type=jnp.float32))
        # PyTorch gate order: i, f, g, o.
        i_g = _sigmoid_via_tanh(gates[:, 0 * H:1 * H])
        f_g = _sigmoid_via_tanh(gates[:, 1 * H:2 * H])
        g_g = jnp.tanh(gates[:, 2 * H:3 * H])
        o_g = _sigmoid_via_tanh(gates[:, 3 * H:4 * H])
        c_new = f_g * c_prev + i_g * g_g
        h_new = o_g * jnp.tanh(c_new)
        if needs_mask:
            # Padded timesteps must not advance the recurrence.
            valid = (t0 + u) < t_valid
            h_new = jnp.where(valid, h_new, h_prev)
            c_new = jnp.where(valid, c_new, c_prev)
        return h_new, c_new

    h_fin, c_fin = jax.lax.fori_loop(0, tu, step, (h_sc[...], c_sc[...]),
                                     unroll=inner_unroll)
    h_sc[...] = h_fin
    c_sc[...] = c_fin

    # Only the last (valid) timestep's hidden state is needed by the FC head.
    @pl.when(t_blk == nt - 1)
    def _():
        h_out_ref[...] = h_fin.astype(h_out_ref.dtype)


def _chip_params():
    """Best-effort chip query with conservative fallbacks."""
    vmem_cap = 64 * 1024 * 1024          # v7x per-core VMEM (smallest case)
    try:
        info = pltpu.get_tpu_info()
        vmem_cap = int(getattr(info, "vmem_capacity_bytes", vmem_cap))
    except Exception:
        pass
    two_tc = False
    try:
        two_tc = "v7" in jax.devices()[0].device_kind.lower()
    except Exception:
        pass
    return vmem_cap, two_tc


def lstm_forward(x, w_ih, w_hh, b, w_fc, b_fc, *, time_unroll=32):
    """x: (B, T, I) f32 -> (B, C) f32.  Matches nn.LSTM(batch_first)+Linear."""
    B, T, I = x.shape
    H = w_hh.shape[0]
    vmem_cap, two_tc = _chip_params()

    # ---- Hoisted input projection, directly in (T, B, 4H) layout ----------
    # Transposing x (B*T*I elems) is far cheaper than transposing gx
    # (B*T*4H elems).  bf16 operands, f32 accumulation, bias added once, then
    # the result is stored as bf16 to halve the kernel's HBM read stream.
    x_t = jnp.transpose(x, (1, 0, 2))                                # (T, B, I)
    gx = jnp.dot(x_t.reshape(T * B, I).astype(jnp.bfloat16),
                 w_ih.astype(jnp.bfloat16),
                 preferred_element_type=jnp.float32) + b             # f32
    gx = gx.astype(jnp.bfloat16).reshape(T, B, 4 * H)                # (T,B,4H)

    # ---- Pad batch to a full sublane group ---------------------------------
    B_pad = ((B + 7) // 8) * 8

    # ---- Batch split only where it helps (v7x megacore) --------------------
    if two_tc and B_pad % 32 == 0 and B_pad // 2 >= 128:
        nb = 2
    else:
        nb = 1
    b_blk = B_pad // nb

    # ---- Time blocking from a per-chip VMEM budget (gx is double-buffered) -
    gx_row_bytes = b_blk * 4 * H * 2                                 # bf16
    budget = max(2 * 1024 * 1024, vmem_cap // 4)
    tu = int(max(1, min(time_unroll, T, budget // (2 * gx_row_bytes))))
    T_pad = ((T + tu - 1) // tu) * tu
    nt = T_pad // tu
    needs_mask = (T_pad != T)

    if B_pad != B or T_pad != T:
        gx = jnp.pad(gx, ((0, T_pad - T), (0, B_pad - B), (0, 0)))

    w_hh_bf16 = w_hh.astype(jnp.bfloat16)

    # Bound per-unrolled-step register pressure (one f32 gates tile live per
    # unrolled step); full unroll when it comfortably fits in vregs.
    gates_tile_bytes = b_blk * 4 * H * 4
    inner_unroll = True if gates_tile_bytes <= 64 * 1024 else 8

    gx_block_bytes = tu * gx_row_bytes
    vmem_needed = (2 * gx_block_bytes            # double-buffered gx block
                   + 2 * w_hh_bf16.size * 2      # (default) double-buffered W_hh
                   + 2 * b_blk * H * 4           # h/c scratch
                   + 2 * b_blk * H * 4)          # output block
    vmem_limit = int(min(vmem_cap * 3 // 4,
                         max(32 * 1024 * 1024, 2 * vmem_needed)))

    cost = pl.CostEstimate(
        flops=int(2 * T_pad * B_pad * H * 4 * H + 12 * T_pad * B_pad * H),
        transcendentals=int(5 * T_pad * B_pad * H),
        bytes_accessed=int(gx.size * 2 + w_hh_bf16.size * 2 + B_pad * H * 4),
    )

    kernel = functools.partial(lstm_recurrent_kernel, t_valid=T,
                               needs_mask=needs_mask,
                               inner_unroll=inner_unroll)

    h_T = pl.pallas_call(
        kernel,
        out_shape=jax.ShapeDtypeStruct((B_pad, H), jnp.float32),
        grid_spec=pltpu.PrefetchScalarGridSpec(
            num_scalar_prefetch=0,
            grid=(nb, nt),                       # carry (time) axis last
            in_specs=[
                # gx block: TU timesteps of one batch block, bf16
                pl.BlockSpec((tu, b_blk, 4 * H), lambda bb, tt: (tt, bb, 0)),
                # loop-invariant recurrent weights (DMA'd once; see TODO above
                # about single-buffering / MXU-resident W_hh at large H)
                pl.BlockSpec((H, 4 * H), lambda bb, tt: (0, 0)),
            ],
            out_specs=pl.BlockSpec((b_blk, H), lambda bb, tt: (bb, 0)),
            scratch_shapes=[
                pltpu.VMEM((b_blk, H), jnp.float32),   # h carry
                pltpu.VMEM((b_blk, H), jnp.float32),   # c carry
            ],
        ),
        compiler_params=pltpu.CompilerParams(
            dimension_semantics=("parallel", "arbitrary"),
            vmem_limit_bytes=vmem_limit),
        cost_estimate=cost,
    )(gx, w_hh_bf16)

    # ---- Tiny FC head once, outside the recurrent kernel -------------------
    return jnp.dot(h_T[:B], w_fc, preferred_element_type=jnp.float32) + b_fc


def lstm_reference(x, w_ih, w_hh, b, w_fc, b_fc):
    """Plain-JAX f32 reference mirroring nn.LSTM(batch_first) + nn.Linear."""
    B, T, I = x.shape
    H = w_hh.shape[0]
    h = jnp.zeros((B, H), jnp.float32)
    c = jnp.zeros((B, H), jnp.float32)
    for t in range(T):
        gates = x[:, t, :] @ w_ih + h @ w_hh + b
        i_g = jax.nn.sigmoid(gates[:, 0 * H:1 * H])
        f_g = jax.nn.sigmoid(gates[:, 1 * H:2 * H])
        g_g = jnp.tanh(gates[:, 2 * H:3 * H])
        o_g = jax.nn.sigmoid(gates[:, 3 * H:4 * H])
        c = f_g * c + i_g * g_g
        h = o_g * jnp.tanh(c)
    return h @ w_fc + b_fc


if __name__ == "__main__":
    # Small shapes consistent with the module's forward:
    # x: (batch, seq, input_size); LSTM hidden_size H; Linear -> num_classes.
    B, T, I, H, C = 2, 8, 16, 32, 4

    key = jax.random.PRNGKey(0)
    ks = jax.random.split(key, 7)
    k_bound = 1.0 / jnp.sqrt(jnp.float32(H))  # PyTorch-style uniform init

    x = jax.random.normal(ks[0], (B, T, I), jnp.float32)

    # PyTorch stores weight_ih_l0 as (4H, I); we keep the transposed (I, 4H).
    w_ih = jax.random.uniform(ks[1], (I, 4 * H), jnp.float32, -k_bound, k_bound)
    w_hh = jax.random.uniform(ks[2], (H, 4 * H), jnp.float32, -k_bound, k_bound)
    b_ih = jax.random.uniform(ks[3], (1, 4 * H), jnp.float32, -k_bound, k_bound)
    b_hh = jax.random.uniform(ks[4], (1, 4 * H), jnp.float32, -k_bound, k_bound)
    b = b_ih + b_hh
    w_fc = jax.random.uniform(ks[5], (H, C), jnp.float32, -k_bound, k_bound)
    b_fc = jax.random.uniform(ks[6], (1, C), jnp.float32, -k_bound, k_bound)

    out = lstm_forward(x, w_ih, w_hh, b, w_fc, b_fc)
    out = jax.block_until_ready(out)

    ref = lstm_reference(x, w_ih, w_hh, b, w_fc, b_fc)
    assert out.shape == (B, C)
    # Tolerance loosened vs the pure-f32 reference because matmul operands and
    # the stored gx stream are bf16 (f32 accumulation / f32 gate math).
    assert jnp.allclose(out, ref, atol=2e-2, rtol=2e-2), (
        jnp.max(jnp.abs(out - ref)))

    print("KERNEL_OK")
</pallas_src>

<mosaic_0001>
module attributes {stable_mosaic.version = 11 : i64} {
  func.func @lstm_recurrent_kernel(%arg0: i32, %arg1: i32, %arg2: memref<8x8x128xbf16, #tpu.memory_space<vmem>>, %arg3: memref<32x128xbf16, #tpu.memory_space<vmem>>, %arg4: memref<8x32xf32, #tpu.memory_space<vmem>>, %arg5: memref<8x32xf32, #tpu.memory_space<vmem>>, %arg6: memref<8x32xf32, #tpu.memory_space<vmem>>) attributes {dimension_semantics = [#tpu.dimension_semantics<parallel>, #tpu.dimension_semantics<arbitrary>], iteration_bounds = array<i64: 1, 1>, scalar_prefetch = 0 : i64, scratch_operands = 2 : i64, tpu.core_type = #tpu.core_type<tc>, window_params = [{transform_indices = @transform_0, window_bounds = array<i64: 8, 8, 128>}, {pipeline_mode = #tpu.pipeline_mode<synchronous>, transform_indices = @transform_1, window_bounds = array<i64: 32, 128>}, {transform_indices = @transform_2, window_bounds = array<i64: 8, 32>}]} {
    %c0_i32 = arith.constant 0 : i32
    %0 = arith.cmpi eq, %arg1, %c0_i32 : i32
    %1 = arith.extui %0 : i1 to i32
    %c0_i32_0 = arith.constant 0 : i32
    %2 = arith.cmpi ne, %1, %c0_i32_0 : i32
    scf.if %2 {
      %cst_108 = arith.constant 0.000000e+00 : f32
      %315 = vector.broadcast %cst_108 : f32 to vector<8x32xf32>
      %c0_109 = arith.constant 0 : index
      %c0_110 = arith.constant 0 : index
      %316 = vector.load %arg5[%c0_109, %c0_110] : memref<8x32xf32, #tpu.memory_space<vmem>>, vector<8x32xf32>
      tpu.vector_store %arg5[%c0_109, %c0_110], %315 {strides = array<i32>} : memref<8x32xf32, #tpu.memory_space<vmem>>, vector<8x32xf32>,
      %cst_111 = arith.constant 0.000000e+00 : f32
      %317 = vector.broadcast %cst_111 : f32 to vector<8x32xf32>
      %c0_112 = arith.constant 0 : index
      %c0_113 = arith.constant 0 : index
      %318 = vector.load %arg6[%c0_112, %c0_113] : memref<8x32xf32, #tpu.memory_space<vmem>>, vector<8x32xf32>
      tpu.vector_store %arg6[%c0_112, %c0_113], %317 {strides = array<i32>} : memref<8x32xf32, #tpu.memory_space<vmem>>, vector<8x32xf32>,
    } else {
    }
    %c0 = arith.constant 0 : index
    %c0_1 = arith.constant 0 : index
    %3 = vector.load %arg3[%c0, %c0_1] : memref<32x128xbf16, #tpu.memory_space<vmem>>, vector<32x128xbf16>
    %c0_2 = arith.constant 0 : index
    %c0_3 = arith.constant 0 : index
    %4 = vector.load %arg5[%c0_2, %c0_3] : memref<8x32xf32, #tpu.memory_space<vmem>>, vector<8x32xf32>
    %c0_4 = arith.constant 0 : index
    %c0_5 = arith.constant 0 : index
    %5 = vector.load %arg6[%c0_4, %c0_5] : memref<8x32xf32, #tpu.memory_space<vmem>>, vector<8x32xf32>
    %c0_i32_6 = arith.constant 0 : i32
    %6 = arith.index_cast %c0_i32_6 : i32 to index
    %c0_7 = arith.constant 0 : index
    %c0_8 = arith.constant 0 : index
    %7 = vector.load %arg2[%6, %c0_7, %c0_8] : memref<8x8x128xbf16, #tpu.memory_space<vmem>>, vector<1x8x128xbf16>
    %8 = vector.shape_cast %7 : vector<1x8x128xbf16> to vector<8x128xbf16>
    %9 = arith.extf %8 : vector<8x128xbf16> to vector<8x128xf32>
    %10 = arith.truncf %4 : vector<8x32xf32> to vector<8x32xbf16>
    %cst = arith.constant dense<0.000000e+00> : vector<8x128xf32>
    %11 = tpu.matmul %10, %3, %cst {dimension_numbers = #tpu.dot_dimension_numbers<[1], [0], [0], [1], [0, 0, 1, 1], [], []>} : vector<8x32xbf16>, vector<32x128xbf16>, vector<8x128xf32> -> vector<8x128xf32>
    %12 = arith.addf %9, %11 : vector<8x128xf32>
    %13 = vector.extract_strided_slice %12 {offsets = [0, 0], sizes = [8, 32], strides = [1, 1]} : vector<8x128xf32> to vector<8x32xf32>
    %cst_9 = arith.constant 5.000000e-01 : f32
    %14 = vector.broadcast %cst_9 : f32 to vector<8x32xf32>
    %15 = arith.mulf %14, %13 : vector<8x32xf32>
    %16 = math.tanh %15 : vector<8x32xf32>
    %cst_10 = arith.constant 5.000000e-01 : f32
    %17 = vector.broadcast %cst_10 : f32 to vector<8x32xf32>
    %18 = arith.mulf %17, %16 : vector<8x32xf32>
    %cst_11 = arith.constant 5.000000e-01 : f32
    %19 = vector.broadcast %cst_11 : f32 to vector<8x32xf32>
    %20 = arith.addf %18, %19 : vector<8x32xf32>
    %21 = vector.extract_strided_slice %12 {offsets = [0, 32], sizes = [8, 32], strides = [1, 1]} : vector<8x128xf32> to vector<8x32xf32>
    %cst_12 = arith.constant 5.000000e-01 : f32
    %22 = vector.broadcast %cst_12 : f32 to vector<8x32xf32>
    %23 = arith.mulf %22, %21 : vector<8x32xf32>
    %24 = math.tanh %23 : vector<8x32xf32>
    %cst_13 = arith.constant 5.000000e-01 : f32
    %25 = vector.broadcast %cst_13 : f32 to vector<8x32xf32>
    %26 = arith.mulf %25, %24 : vector<8x32xf32>
    %cst_14 = arith.constant 5.000000e-01 : f32
    %27 = vector.broadcast %cst_14 : f32 to vector<8x32xf32>
    %28 = arith.addf %26, %27 : vector<8x32xf32>
    %29 = vector.extract_strided_slice %12 {offsets = [0, 64], sizes = [8, 32], strides = [1, 1]} : vector<8x128xf32> to vector<8x32xf32>
    %30 = math.tanh %29 : vector<8x32xf32>
    %31 = vector.extract_strided_slice %12 {offsets = [0, 96], sizes = [8, 32], strides = [1, 1]} : vector<8x128xf32> to vector<8x32xf32>
    %cst_15 = arith.constant 5.000000e-01 : f32
    %32 = vector.broadcast %cst_15 : f32 to vector<8x32xf32>
    %33 = arith.mulf %32, %31 : vector<8x32xf32>
    %34 = math.tanh %33 : vector<8x32xf32>
    %cst_16 = arith.constant 5.000000e-01 : f32
    %35 = vector.broadcast %cst_16 : f32 to vector<8x32xf32>
    %36 = arith.mulf %35, %34 : vector<8x32xf32>
    %cst_17 = arith.constant 5.000000e-01 : f32
    %37 = vector.broadcast %cst_17 : f32 to vector<8x32xf32>
    %38 = arith.addf %36, %37 : vector<8x32xf32>
    %39 = arith.mulf %28, %5 : vector<8x32xf32>
    %40 = arith.mulf %20, %30 : vector<8x32xf32>
    %41 = arith.addf %39, %40 : vector<8x32xf32>
    %42 = math.tanh %41 : vector<8x32xf32>
    %43 = arith.mulf %38, %42 : vector<8x32xf32>
    %c1_i32 = arith.constant 1 : i32
    %44 = arith.index_cast %c1_i32 : i32 to index
    %c0_18 = arith.constant 0 : index
    %c0_19 = arith.constant 0 : index
    %45 = vector.load %arg2[%44, %c0_18, %c0_19] : memref<8x8x128xbf16, #tpu.memory_space<vmem>>, vector<1x8x128xbf16>
    %46 = vector.shape_cast %45 : vector<1x8x128xbf16> to vector<8x128xbf16>
    %47 = arith.extf %46 : vector<8x128xbf16> to vector<8x128xf32>
    %48 = arith.truncf %43 : vector<8x32xf32> to vector<8x32xbf16>
    %cst_20 = arith.constant dense<0.000000e+00> : vector<8x128xf32>
    %49 = tpu.matmul %48, %3, %cst_20 {dimension_numbers = #tpu.dot_dimension_numbers<[1], [0], [0], [1], [0, 0, 1, 1], [], []>} : vector<8x32xbf16>, vector<32x128xbf16>, vector<8x128xf32> -> vector<8x128xf32>
    %50 = arith.addf %47, %49 : vector<8x128xf32>
    %51 = vector.extract_strided_slice %50 {offsets = [0, 0], sizes = [8, 32], strides = [1, 1]} : vector<8x128xf32> to vector<8x32xf32>
    %cst_21 = arith.constant 5.000000e-01 : f32
    %52 = vector.broadcast %cst_21 : f32 to vector<8x32xf32>
    %53 = arith.mulf %52, %51 : vector<8x32xf32>
    %54 = math.tanh %53 : vector<8x32xf32>
    %cst_22 = arith.constant 5.000000e-01 : f32
    %55 = vector.broadcast %cst_22 : f32 to vector<8x32xf32>
    %56 = arith.mulf %55, %54 : vector<8x32xf32>
    %cst_23 = arith.constant 5.000000e-01 : f32
    %57 = vector.broadcast %cst_23 : f32 to vector<8x32xf32>
    %58 = arith.addf %56, %57 : vector<8x32xf32>
    %59 = vector.extract_strided_slice %50 {offsets = [0, 32], sizes = [8, 32], strides = [1, 1]} : vector<8x128xf32> to vector<8x32xf32>
    %cst_24 = arith.constant 5.000000e-01 : f32
    %60 = vector.broadcast %cst_24 : f32 to vector<8x32xf32>
    %61 = arith.mulf %60, %59 : vector<8x32xf32>
    %62 = math.tanh %61 : vector<8x32xf32>
    %cst_25 = arith.constant 5.000000e-01 : f32
    %63 = vector.broadcast %cst_25 : f32 to vector<8x32xf32>
    %64 = arith.mulf %63, %62 : vector<8x32xf32>
    %cst_26 = arith.constant 5.000000e-01 : f32
    %65 = vector.broadcast %cst_26 : f32 to vector<8x32xf32>
    %66 = arith.addf %64, %65 : vector<8x32xf32>
    %67 = vector.extract_strided_slice %50 {offsets = [0, 64], sizes = [8, 32], strides = [1, 1]} : vector<8x128xf32> to vector<8x32xf32>
    %68 = math.tanh %67 : vector<8x32xf32>
    %69 = vector.extract_strided_slice %50 {offsets = [0, 96], sizes = [8, 32], strides = [1, 1]} : vector<8x128xf32> to vector<8x32xf32>
    %cst_27 = arith.constant 5.000000e-01 : f32
    %70 = vector.broadcast %cst_27 : f32 to vector<8x32xf32>
    %71 = arith.mulf %70, %69 : vector<8x32xf32>
    %72 = math.tanh %71 : vector<8x32xf32>
    %cst_28 = arith.constant 5.000000e-01 : f32
    %73 = vector.broadcast %cst_28 : f32 to vector<8x32xf32>
    %74 = arith.mulf %73, %72 : vector<8x32xf32>
    %cst_29 = arith.constant 5.000000e-01 : f32
    %75 = vector.broadcast %cst_29 : f32 to vector<8x32xf32>
    %76 = arith.addf %74, %75 : vector<8x32xf32>
    %77 = arith.mulf %66, %41 : vector<8x32xf32>
    %78 = arith.mulf %58, %68 : vector<8x32xf32>
    %79 = arith.addf %77, %78 : vector<8x32xf32>
    %80 = math.tanh %79 : vector<8x32xf32>
    %81 = arith.mulf %76, %80 : vector<8x32xf32>
    %c2_i32 = arith.constant 2 : i32
    %82 = arith.index_cast %c2_i32 : i32 to index
    %c0_30 = arith.constant 0 : index
    %c0_31 = arith.constant 0 : index
    %83 = vector.load %arg2[%82, %c0_30, %c0_31] : memref<8x8x128xbf16, #tpu.memory_space<vmem>>, vector<1x8x128xbf16>
    %84 = vector.shape_cast %83 : vector<1x8x128xbf16> to vector<8x128xbf16>
    %85 = arith.extf %84 : vector<8x128xbf16> to vector<8x128xf32>
    %86 = arith.truncf %81 : vector<8x32xf32> to vector<8x32xbf16>
    %cst_32 = arith.constant dense<0.000000e+00> : vector<8x128xf32>
    %87 = tpu.matmul %86, %3, %cst_32 {dimension_numbers = #tpu.dot_dimension_numbers<[1], [0], [0], [1], [0, 0, 1, 1], [], []>} : vector<8x32xbf16>, vector<32x128xbf16>, vector<8x128xf32> -> vector<8x128xf32>
    %88 = arith.addf %85, %87 : vector<8x128xf32>
    %89 = vector.extract_strided_slice %88 {offsets = [0, 0], sizes = [8, 32], strides = [1, 1]} : vector<8x128xf32> to vector<8x32xf32>
    %cst_33 = arith.constant 5.000000e-01 : f32
    %90 = vector.broadcast %cst_33 : f32 to vector<8x32xf32>
    %91 = arith.mulf %90, %89 : vector<8x32xf32>
    %92 = math.tanh %91 : vector<8x32xf32>
    %cst_34 = arith.constant 5.000000e-01 : f32
    %93 = vector.broadcast %cst_34 : f32 to vector<8x32xf32>
    %94 = arith.mulf %93, %92 : vector<8x32xf32>
    %cst_35 = arith.constant 5.000000e-01 : f32
    %95 = vector.broadcast %cst_35 : f32 to vector<8x32xf32>
    %96 = arith.addf %94, %95 : vector<8x32xf32>
    %97 = vector.extract_strided_slice %88 {offsets = [0, 32], sizes = [8, 32], strides = [1, 1]} : vector<8x128xf32> to vector<8x32xf32>
    %cst_36 = arith.constant 5.000000e-01 : f32
    %98 = vector.broadcast %cst_36 : f32 to vector<8x32xf32>
    %99 = arith.mulf %98, %97 : vector<8x32xf32>
    %100 = math.tanh %99 : vector<8x32xf32>
    %cst_37 = arith.constant 5.000000e-01 : f32
    %101 = vector.broadcast %cst_37 : f32 to vector<8x32xf32>
    %102 = arith.mulf %101, %100 : vector<8x32xf32>
    %cst_38 = arith.constant 5.000000e-01 : f32
    %103 = vector.broadcast %cst_38 : f32 to vector<8x32xf32>
    %104 = arith.addf %102, %103 : vector<8x32xf32>
    %105 = vector.extract_strided_slice %88 {offsets = [0, 64], sizes = [8, 32], strides = [1, 1]} : vector<8x128xf32> to vector<8x32xf32>
    %106 = math.tanh %105 : vector<8x32xf32>
    %107 = vector.extract_strided_slice %88 {offsets = [0, 96], sizes = [8, 32], strides = [1, 1]} : vector<8x128xf32> to vector<8x32xf32>
    %cst_39 = arith.constant 5.000000e-01 : f32
    %108 = vector.broadcast %cst_39 : f32 to vector<8x32xf32>
    %109 = arith.mulf %108, %107 : vector<8x32xf32>
    %110 = math.tanh %109 : vector<8x32xf32>
    %cst_40 = arith.constant 5.000000e-01 : f32
    %111 = vector.broadcast %cst_40 : f32 to vector<8x32xf32>
    %112 = arith.mulf %111, %110 : vector<8x32xf32>
    %cst_41 = arith.constant 5.000000e-01 : f32
    %113 = vector.broadcast %cst_41 : f32 to vector<8x32xf32>
    %114 = arith.addf %112, %113 : vector<8x32xf32>
    %115 = arith.mulf %104, %79 : vector<8x32xf32>
    %116 = arith.mulf %96, %106 : vector<8x32xf32>
    %117 = arith.addf %115, %116 : vector<8x32xf32>
    %118 = math.tanh %117 : vector<8x32xf32>
    %119 = arith.mulf %114, %118 : vector<8x32xf32>
    %c3_i32 = arith.constant 3 : i32
    %120 = arith.index_cast %c3_i32 : i32 to index
    %c0_42 = arith.constant 0 : index
    %c0_43 = arith.constant 0 : index
    %121 = vector.load %arg2[%120, %c0_42, %c0_43] : memref<8x8x128xbf16, #tpu.memory_space<vmem>>, vector<1x8x128xbf16>
    %122 = vector.shape_cast %121 : vector<1x8x128xbf16> to vector<8x128xbf16>
    %123 = arith.extf %122 : vector<8x128xbf16> to vector<8x128xf32>
    %124 = arith.truncf %119 : vector<8x32xf32> to vector<8x32xbf16>
    %cst_44 = arith.constant dense<0.000000e+00> : vector<8x128xf32>
    %125 = tpu.matmul %124, %3, %cst_44 {dimension_numbers = #tpu.dot_dimension_numbers<[1], [0], [0], [1], [0, 0, 1, 1], [], []>} : vector<8x32xbf16>, vector<32x128xbf16>, vector<8x128xf32> -> vector<8x128xf32>
    %126 = arith.addf %123, %125 : vector<8x128xf32>
    %127 = vector.extract_strided_slice %126 {offsets = [0, 0], sizes = [8, 32], strides = [1, 1]} : vector<8x128xf32> to vector<8x32xf32>
    %cst_45 = arith.constant 5.000000e-01 : f32
    %128 = vector.broadcast %cst_45 : f32 to vector<8x32xf32>
    %129 = arith.mulf %128, %127 : vector<8x32xf32>
    %130 = math.tanh %129 : vector<8x32xf32>
    %cst_46 = arith.constant 5.000000e-01 : f32
    %131 = vector.broadcast %cst_46 : f32 to vector<8x32xf32>
    %132 = arith.mulf %131, %130 : vector<8x32xf32>
    %cst_47 = arith.constant 5.000000e-01 : f32
    %133 = vector.broadcast %cst_47 : f32 to vector<8x32xf32>
    %134 = arith.addf %132, %133 : vector<8x32xf32>
    %135 = vector.extract_strided_slice %126 {offsets = [0, 32], sizes = [8, 32], strides = [1, 1]} : vector<8x128xf32> to vector<8x32xf32>
    %cst_48 = arith.constant 5.000000e-01 : f32
    %136 = vector.broadcast %cst_48 : f32 to vector<8x32xf32>
    %137 = arith.mulf %136, %135 : vector<8x32xf32>
    %138 = math.tanh %137 : vector<8x32xf32>
    %cst_49 = arith.constant 5.000000e-01 : f32
    %139 = vector.broadcast %cst_49 : f32 to vector<8x32xf32>
    %140 = arith.mulf %139, %138 : vector<8x32xf32>
    %cst_50 = arith.constant 5.000000e-01 : f32
    %141 = vector.broadcast %cst_50 : f32 to vector<8x32xf32>
    %142 = arith.addf %140, %141 : vector<8x32xf32>
    %143 = vector.extract_strided_slice %126 {offsets = [0, 64], sizes = [8, 32], strides = [1, 1]} : vector<8x128xf32> to vector<8x32xf32>
    %144 = math.tanh %143 : vector<8x32xf32>
    %145 = vector.extract_strided_slice %126 {offsets = [0, 96], sizes = [8, 32], strides = [1, 1]} : vector<8x128xf32> to vector<8x32xf32>
    %cst_51 = arith.constant 5.000000e-01 : f32
    %146 = vector.broadcast %cst_51 : f32 to vector<8x32xf32>
    %147 = arith.mulf %146, %145 : vector<8x32xf32>
    %148 = math.tanh %147 : vector<8x32xf32>
    %cst_52 = arith.constant 5.000000e-01 : f32
    %149 = vector.broadcast %cst_52 : f32 to vector<8x32xf32>
    %150 = arith.mulf %149, %148 : vector<8x32xf32>
    %cst_53 = arith.constant 5.000000e-01 : f32
    %151 = vector.broadcast %cst_53 : f32 to vector<8x32xf32>
    %152 = arith.addf %150, %151 : vector<8x32xf32>
    %153 = arith.mulf %142, %117 : vector<8x32xf32>
    %154 = arith.mulf %134, %144 : vector<8x32xf32>
    %155 = arith.addf %153, %154 : vector<8x32xf32>
    %156 = math.tanh %155 : vector<8x32xf32>
    %157 = arith.mulf %152, %156 : vector<8x32xf32>
    %c4_i32 = arith.constant 4 : i32
    %158 = arith.index_cast %c4_i32 : i32 to index
    %c0_54 = arith.constant 0 : index
    %c0_55 = arith.constant 0 : index
    %159 = vector.load %arg2[%158, %c0_54, %c0_55] : memref<8x8x128xbf16, #tpu.memory_space<vmem>>, vector<1x8x128xbf16>
    %160 = vector.shape_cast %159 : vector<1x8x128xbf16> to vector<8x128xbf16>
    %161 = arith.extf %160 : vector<8x128xbf16> to vector<8x128xf32>
    %162 = arith.truncf %157 : vector<8x32xf32> to vector<8x32xbf16>
    %cst_56 = arith.constant dense<0.000000e+00> : vector<8x128xf32>
    %163 = tpu.matmul %162, %3, %cst_56 {dimension_numbers = #tpu.dot_dimension_numbers<[1], [0], [0], [1], [0, 0, 1, 1], [], []>} : vector<8x32xbf16>, vector<32x128xbf16>, vector<8x128xf32> -> vector<8x128xf32>
    %164 = arith.addf %161, %163 : vector<8x128xf32>
    %165 = vector.extract_strided_slice %164 {offsets = [0, 0], sizes = [8, 32], strides = [1, 1]} : vector<8x128xf32> to vector<8x32xf32>
    %cst_57 = arith.constant 5.000000e-01 : f32
    %166 = vector.broadcast %cst_57 : f32 to vector<8x32xf32>
    %167 = arith.mulf %166, %165 : vector<8x32xf32>
    %168 = math.tanh %167 : vector<8x32xf32>
    %cst_58 = arith.constant 5.000000e-01 : f32
    %169 = vector.broadcast %cst_58 : f32 to vector<8x32xf32>
    %170 = arith.mulf %169, %168 : vector<8x32xf32>
    %cst_59 = arith.constant 5.000000e-01 : f32
    %171 = vector.broadcast %cst_59 : f32 to vector<8x32xf32>
    %172 = arith.addf %170, %171 : vector<8x32xf32>
    %173 = vector.extract_strided_slice %164 {offsets = [0, 32], sizes = [8, 32], strides = [1, 1]} : vector<8x128xf32> to vector<8x32xf32>
    %cst_60 = arith.constant 5.000000e-01 : f32
    %174 = vector.broadcast %cst_60 : f32 to vector<8x32xf32>
    %175 = arith.mulf %174, %173 : vector<8x32xf32>
    %176 = math.tanh %175 : vector<8x32xf32>
    %cst_61 = arith.constant 5.000000e-01 : f32
    %177 = vector.broadcast %cst_61 : f32 to vector<8x32xf32>
    %178 = arith.mulf %177, %176 : vector<8x32xf32>
    %cst_62 = arith.constant 5.000000e-01 : f32
    %179 = vector.broadcast %cst_62 : f32 to vector<8x32xf32>
    %180 = arith.addf %178, %179 : vector<8x32xf32>
    %181 = vector.extract_strided_slice %164 {offsets = [0, 64], sizes = [8, 32], strides = [1, 1]} : vector<8x128xf32> to vector<8x32xf32>
    %182 = math.tanh %181 : vector<8x32xf32>
    %183 = vector.extract_strided_slice %164 {offsets = [0, 96], sizes = [8, 32], strides = [1, 1]} : vector<8x128xf32> to vector<8x32xf32>
    %cst_63 = arith.constant 5.000000e-01 : f32
    %184 = vector.broadcast %cst_63 : f32 to vector<8x32xf32>
    %185 = arith.mulf %184, %183 : vector<8x32xf32>
    %186 = math.tanh %185 : vector<8x32xf32>
    %cst_64 = arith.constant 5.000000e-01 : f32
    %187 = vector.broadcast %cst_64 : f32 to vector<8x32xf32>
    %188 = arith.mulf %187, %186 : vector<8x32xf32>
    %cst_65 = arith.constant 5.000000e-01 : f32
    %189 = vector.broadcast %cst_65 : f32 to vector<8x32xf32>
    %190 = arith.addf %188, %189 : vector<8x32xf32>
    %191 = arith.mulf %180, %155 : vector<8x32xf32>
    %192 = arith.mulf %172, %182 : vector<8x32xf32>
    %193 = arith.addf %191, %192 : vector<8x32xf32>
    %194 = math.tanh %193 : vector<8x32xf32>
    %195 = arith.mulf %190, %194 : vector<8x32xf32>
    %c5_i32 = arith.constant 5 : i32
    %196 = arith.index_cast %c5_i32 : i32 to index
    %c0_66 = arith.constant 0 : index
    %c0_67 = arith.constant 0 : index
    %197 = vector.load %arg2[%196, %c0_66, %c0_67] : memref<8x8x128xbf16, #tpu.memory_space<vmem>>, vector<1x8x128xbf16>
    %198 = vector.shape_cast %197 : vector<1x8x128xbf16> to vector<8x128xbf16>
    %199 = arith.extf %198 : vector<8x128xbf16> to vector<8x128xf32>
    %200 = arith.truncf %195 : vector<8x32xf32> to vector<8x32xbf16>
    %cst_68 = arith.constant dense<0.000000e+00> : vector<8x128xf32>
    %201 = tpu.matmul %200, %3, %cst_68 {dimension_numbers = #tpu.dot_dimension_numbers<[1], [0], [0], [1], [0, 0, 1, 1], [], []>} : vector<8x32xbf16>, vector<32x128xbf16>, vector<8x128xf32> -> vector<8x128xf32>
    %202 = arith.addf %199, %201 : vector<8x128xf32>
    %203 = vector.extract_strided_slice %202 {offsets = [0, 0], sizes = [8, 32], strides = [1, 1]} : vector<8x128xf32> to vector<8x32xf32>
    %cst_69 = arith.constant 5.000000e-01 : f32
    %204 = vector.broadcast %cst_69 : f32 to vector<8x32xf32>
    %205 = arith.mulf %204, %203 : vector<8x32xf32>
    %206 = math.tanh %205 : vector<8x32xf32>
    %cst_70 = arith.constant 5.000000e-01 : f32
    %207 = vector.broadcast %cst_70 : f32 to vector<8x32xf32>
    %208 = arith.mulf %207, %206 : vector<8x32xf32>
    %cst_71 = arith.constant 5.000000e-01 : f32
    %209 = vector.broadcast %cst_71 : f32 to vector<8x32xf32>
    %210 = arith.addf %208, %209 : vector<8x32xf32>
    %211 = vector.extract_strided_slice %202 {offsets = [0, 32], sizes = [8, 32], strides = [1, 1]} : vector<8x128xf32> to vector<8x32xf32>
    %cst_72 = arith.constant 5.000000e-01 : f32
    %212 = vector.broadcast %cst_72 : f32 to vector<8x32xf32>
    %213 = arith.mulf %212, %211 : vector<8x32xf32>
    %214 = math.tanh %213 : vector<8x32xf32>
    %cst_73 = arith.constant 5.000000e-01 : f32
    %215 = vector.broadcast %cst_73 : f32 to vector<8x32xf32>
    %216 = arith.mulf %215, %214 : vector<8x32xf32>
    %cst_74 = arith.constant 5.000000e-01 : f32
    %217 = vector.broadcast %cst_74 : f32 to vector<8x32xf32>
    %218 = arith.addf %216, %217 : vector<8x32xf32>
    %219 = vector.extract_strided_slice %202 {offsets = [0, 64], sizes = [8, 32], strides = [1, 1]} : vector<8x128xf32> to vector<8x32xf32>
    %220 = math.tanh %219 : vector<8x32xf32>
    %221 = vector.extract_strided_slice %202 {offsets = [0, 96], sizes = [8, 32], strides = [1, 1]} : vector<8x128xf32> to vector<8x32xf32>
    %cst_75 = arith.constant 5.000000e-01 : f32
    %222 = vector.broadcast %cst_75 : f32 to vector<8x32xf32>
    %223 = arith.mulf %222, %221 : vector<8x32xf32>
    %224 = math.tanh %223 : vector<8x32xf32>
    %cst_76 = arith.constant 5.000000e-01 : f32
    %225 = vector.broadcast %cst_76 : f32 to vector<8x32xf32>
    %226 = arith.mulf %225, %224 : vector<8x32xf32>
    %cst_77 = arith.constant 5.000000e-01 : f32
    %227 = vector.broadcast %cst_77 : f32 to vector<8x32xf32>
    %228 = arith.addf %226, %227 : vector<8x32xf32>
    %229 = arith.mulf %218, %193 : vector<8x32xf32>
    %230 = arith.mulf %210, %220 : vector<8x32xf32>
    %231 = arith.addf %229, %230 : vector<8x32xf32>
    %232 = math.tanh %231 : vector<8x32xf32>
    %233 = arith.mulf %228, %232 : vector<8x32xf32>
    %c6_i32 = arith.constant 6 : i32
    %234 = arith.index_cast %c6_i32 : i32 to index
    %c0_78 = arith.constant 0 : index
    %c0_79 = arith.constant 0 : index
    %235 = vector.load %arg2[%234, %c0_78, %c0_79] : memref<8x8x128xbf16, #tpu.memory_space<vmem>>, vector<1x8x128xbf16>
    %236 = vector.shape_cast %235 : vector<1x8x128xbf16> to vector<8x128xbf16>
    %237 = arith.extf %236 : vector<8x128xbf16> to vector<8x128xf32>
    %238 = arith.truncf %233 : vector<8x32xf32> to vector<8x32xbf16>
    %cst_80 = arith.constant dense<0.000000e+00> : vector<8x128xf32>
    %239 = tpu.matmul %238, %3, %cst_80 {dimension_numbers = #tpu.dot_dimension_numbers<[1], [0], [0], [1], [0, 0, 1, 1], [], []>} : vector<8x32xbf16>, vector<32x128xbf16>, vector<8x128xf32> -> vector<8x128xf32>
    %240 = arith.addf %237, %239 : vector<8x128xf32>
    %241 = vector.extract_strided_slice %240 {offsets = [0, 0], sizes = [8, 32], strides = [1, 1]} : vector<8x128xf32> to vector<8x32xf32>
    %cst_81 = arith.constant 5.000000e-01 : f32
    %242 = vector.broadcast %cst_81 : f32 to vector<8x32xf32>
    %243 = arith.mulf %242, %241 : vector<8x32xf32>
    %244 = math.tanh %243 : vector<8x32xf32>
    %cst_82 = arith.constant 5.000000e-01 : f32
    %245 = vector.broadcast %cst_82 : f32 to vector<8x32xf32>
    %246 = arith.mulf %245, %244 : vector<8x32xf32>
    %cst_83 = arith.constant 5.000000e-01 : f32
    %247 = vector.broadcast %cst_83 : f32 to vector<8x32xf32>
    %248 = arith.addf %246, %247 : vector<8x32xf32>
    %249 = vector.extract_strided_slice %240 {offsets = [0, 32], sizes = [8, 32], strides = [1, 1]} : vector<8x128xf32> to vector<8x32xf32>
    %cst_84 = arith.constant 5.000000e-01 : f32
    %250 = vector.broadcast %cst_84 : f32 to vector<8x32xf32>
    %251 = arith.mulf %250, %249 : vector<8x32xf32>
    %252 = math.tanh %251 : vector<8x32xf32>
    %cst_85 = arith.constant 5.000000e-01 : f32
    %253 = vector.broadcast %cst_85 : f32 to vector<8x32xf32>
    %254 = arith.mulf %253, %252 : vector<8x32xf32>
    %cst_86 = arith.constant 5.000000e-01 : f32
    %255 = vector.broadcast %cst_86 : f32 to vector<8x32xf32>
    %256 = arith.addf %254, %255 : vector<8x32xf32>
    %257 = vector.extract_strided_slice %240 {offsets = [0, 64], sizes = [8, 32], strides = [1, 1]} : vector<8x128xf32> to vector<8x32xf32>
    %258 = math.tanh %257 : vector<8x32xf32>
    %259 = vector.extract_strided_slice %240 {offsets = [0, 96], sizes = [8, 32], strides = [1, 1]} : vector<8x128xf32> to vector<8x32xf32>
    %cst_87 = arith.constant 5.000000e-01 : f32
    %260 = vector.broadcast %cst_87 : f32 to vector<8x32xf32>
    %261 = arith.mulf %260, %259 : vector<8x32xf32>
    %262 = math.tanh %261 : vector<8x32xf32>
    %cst_88 = arith.constant 5.000000e-01 : f32
    %263 = vector.broadcast %cst_88 : f32 to vector<8x32xf32>
    %264 = arith.mulf %263, %262 : vector<8x32xf32>
    %cst_89 = arith.constant 5.000000e-01 : f32
    %265 = vector.broadcast %cst_89 : f32 to vector<8x32xf32>
    %266 = arith.addf %264, %265 : vector<8x32xf32>
    %267 = arith.mulf %256, %231 : vector<8x32xf32>
    %268 = arith.mulf %248, %258 : vector<8x32xf32>
    %269 = arith.addf %267, %268 : vector<8x32xf32>
    %270 = math.tanh %269 : vector<8x32xf32>
    %271 = arith.mulf %266, %270 : vector<8x32xf32>
    %c7_i32 = arith.constant 7 : i32
    %272 = arith.index_cast %c7_i32 : i32 to index
    %c0_90 = arith.constant 0 : index
    %c0_91 = arith.constant 0 : index
    %273 = vector.load %arg2[%272, %c0_90, %c0_91] : memref<8x8x128xbf16, #tpu.memory_space<vmem>>, vector<1x8x128xbf16>
    %274 = vector.shape_cast %273 : vector<1x8x128xbf16> to vector<8x128xbf16>
    %275 = arith.extf %274 : vector<8x128xbf16> to vector<8x128xf32>
    %276 = arith.truncf %271 : vector<8x32xf32> to vector<8x32xbf16>
    %cst_92 = arith.constant dense<0.000000e+00> : vector<8x128xf32>
    %277 = tpu.matmul %276, %3, %cst_92 {dimension_numbers = #tpu.dot_dimension_numbers<[1], [0], [0], [1], [0, 0, 1, 1], [], []>} : vector<8x32xbf16>, vector<32x128xbf16>, vector<8x128xf32> -> vector<8x128xf32>
    %278 = arith.addf %275, %277 : vector<8x128xf32>
    %279 = vector.extract_strided_slice %278 {offsets = [0, 0], sizes = [8, 32], strides = [1, 1]} : vector<8x128xf32> to vector<8x32xf32>
    %cst_93 = arith.constant 5.000000e-01 : f32
    %280 = vector.broadcast %cst_93 : f32 to vector<8x32xf32>
    %281 = arith.mulf %280, %279 : vector<8x32xf32>
    %282 = math.tanh %281 : vector<8x32xf32>
    %cst_94 = arith.constant 5.000000e-01 : f32
    %283 = vector.broadcast %cst_94 : f32 to vector<8x32xf32>
    %284 = arith.mulf %283, %282 : vector<8x32xf32>
    %cst_95 = arith.constant 5.000000e-01 : f32
    %285 = vector.broadcast %cst_95 : f32 to vector<8x32xf32>
    %286 = arith.addf %284, %285 : vector<8x32xf32>
    %287 = vector.extract_strided_slice %278 {offsets = [0, 32], sizes = [8, 32], strides = [1, 1]} : vector<8x128xf32> to vector<8x32xf32>
    %cst_96 = arith.constant 5.000000e-01 : f32
    %288 = vector.broadcast %cst_96 : f32 to vector<8x32xf32>
    %289 = arith.mulf %288, %287 : vector<8x32xf32>
    %290 = math.tanh %289 : vector<8x32xf32>
    %cst_97 = arith.constant 5.000000e-01 : f32
    %291 = vector.broadcast %cst_97 : f32 to vector<8x32xf32>
    %292 = arith.mulf %291, %290 : vector<8x32xf32>
    %cst_98 = arith.constant 5.000000e-01 : f32
    %293 = vector.broadcast %cst_98 : f32 to vector<8x32xf32>
    %294 = arith.addf %292, %293 : vector<8x32xf32>
    %295 = vector.extract_strided_slice %278 {offsets = [0, 64], sizes = [8, 32], strides = [1, 1]} : vector<8x128xf32> to vector<8x32xf32>
    %296 = math.tanh %295 : vector<8x32xf32>
    %297 = vector.extract_strided_slice %278 {offsets = [0, 96], sizes = [8, 32], strides = [1, 1]} : vector<8x128xf32> to vector<8x32xf32>
    %cst_99 = arith.constant 5.000000e-01 : f32
    %298 = vector.broadcast %cst_99 : f32 to vector<8x32xf32>
    %299 = arith.mulf %298, %297 : vector<8x32xf32>
    %300 = math.tanh %299 : vector<8x32xf32>
    %cst_100 = arith.constant 5.000000e-01 : f32
    %301 = vector.broadcast %cst_100 : f32 to vector<8x32xf32>
    %302 = arith.mulf %301, %300 : vector<8x32xf32>
    %cst_101 = arith.constant 5.000000e-01 : f32
    %303 = vector.broadcast %cst_101 : f32 to vector<8x32xf32>
    %304 = arith.addf %302, %303 : vector<8x32xf32>
    %305 = arith.mulf %294, %269 : vector<8x32xf32>
    %306 = arith.mulf %286, %296 : vector<8x32xf32>
    %307 = arith.addf %305, %306 : vector<8x32xf32>
    %308 = math.tanh %307 : vector<8x32xf32>
    %309 = arith.mulf %304, %308 : vector<8x32xf32>
    %c8_i32 = arith.constant 8 : i32
    %c0_102 = arith.constant 0 : index
    %c0_103 = arith.constant 0 : index
    %310 = vector.load %arg5[%c0_102, %c0_103] : memref<8x32xf32, #tpu.memory_space<vmem>>, vector<8x32xf32>
    tpu.vector_store %arg5[%c0_102, %c0_103], %309 {strides = array<i32>} : memref<8x32xf32, #tpu.memory_space<vmem>>, vector<8x32xf32>,
    %c0_104 = arith.constant 0 : index
    %c0_105 = arith.constant 0 : index
    %311 = vector.load %arg6[%c0_104, %c0_105] : memref<8x32xf32, #tpu.memory_space<vmem>>, vector<8x32xf32>
    tpu.vector_store %arg6[%c0_104, %c0_105], %307 {strides = array<i32>} : memref<8x32xf32, #tpu.memory_space<vmem>>, vector<8x32xf32>,
    %c0_i32_106 = arith.constant 0 : i32
    %312 = arith.cmpi eq, %arg1, %c0_i32_106 : i32
    %313 = arith.extui %312 : i1 to i32
    %c0_i32_107 = arith.constant 0 : i32
    %314 = arith.cmpi ne, %313, %c0_i32_107 : i32
    scf.if %314 {
      %c0_108 = arith.constant 0 : index
      %c0_109 = arith.constant 0 : index
      %315 = vector.load %arg4[%c0_108, %c0_109] : memref<8x32xf32, #tpu.memory_space<vmem>>, vector<8x32xf32>
      tpu.vector_store %arg4[%c0_108, %c0_109], %309 {strides = array<i32>} : memref<8x32xf32, #tpu.memory_space<vmem>>, vector<8x32xf32>,
    } else {
    }
    return
  }
  func.func @transform_0(%arg0: i32, %arg1: i32) -> (i32, i32, i32) {
    %c0_i32 = arith.constant 0 : i32
    %c0_i32_0 = arith.constant 0 : i32
    return %arg1, %arg0, %c0_i32 : i32, i32, i32
  }
  func.func @transform_1(%arg0: i32, %arg1: i32) -> (i32, i32) {
    %c0_i32 = arith.constant 0 : i32
    %c0_i32_0 = arith.constant 0 : i32
    %c0_i32_1 = arith.constant 0 : i32
    return %c0_i32, %c0_i32_0 : i32, i32
  }
  func.func @transform_2(%arg0: i32, %arg1: i32) -> (i32, i32) {
    %c0_i32 = arith.constant 0 : i32
    %c0_i32_0 = arith.constant 0 : i32
    return %arg0, %c0_i32 : i32, i32
  }
}

</mosaic_0001>

<bundles_post_ra>
// kernel: tpu_custom_call.1
= control target key start
LH: loop header
LB: loop body
LE: loop exit
PB: predicated region body
PF: predicated region fallthrough
CT: control target
= control target key end

     0   :  { %7 = vsyncpa [#allocation5], 0  ;;  %s705_s0 = inlined_call_operand.hbm [shape: bf16[8,8,128], index: 0, kind: input, shape index: {}]   ;;  %s706_s1 = inlined_call_operand.hbm [shape: bf16[32,128], index: 1, kind: input, shape index: {}]   ;;  %s707_s2 = inlined_call_operand.hbm [shape: f32[8,32], index: 2, kind: output, shape index: {}]  }
   0x1   :  { %8 = vsyncpa [#allocation8], 0 }
   0x2   :  { %9 = vsyncpa [#allocation6], 0  ;;  %s14_s11 = sshll.u32 %s705_s0, 4  ;;  %s623_s12 = smov [#allocation4]   ;;  %s15_s11 = int_to_ptr.hbm [resolvable:$true] %s14_s11 }
   0x3   :  { %s16_s13 = sshll.u32 %s623_s12, 4  ;;  %s27_s16 = sshll.u32 %s706_s1, 4  ;;  %s17_s13 = int_to_ptr.vmem [resolvable:$true] %s16_s13  ;;  %s28_s16 = int_to_ptr.hbm [resolvable:$true] %s27_s16 }
   0x4   :  { %s624_s17 = smov 64   ;;  %s625_s18 = smov 4  }
   0x5   :  { %22 = dma.hbm_to_vmem [thread:$0]  %s15_s11, 512, %s17_s13, [#allocation5], %s624_s17, %s624_s17, %s625_s18  }
   0x6   :  { %s626_s19 = smov [#allocation7]  }
   0x7   :  { %s29_s20 = sshll.u32 %s626_s19, 4  ;;  %s30_s20 = int_to_ptr.vmem [resolvable:$true] %s29_s20 }
   0x8   :  { %35 = dma.hbm_to_vmem [thread:$0]  %s28_s16, 256, %s30_s20, [#allocation8], %s624_s17, %s624_s17, %s625_s18  }
   0x9   :  { %617 = dma.done.wait [#allocation5], 512  }
   0xa   :  { %618 = vsyncadd [#allocation5], 4294966784 }
   0xb   :  { %619 = dma.done.wait [#allocation8], 256  }
   0xc   :  { %620 = vsyncadd [#allocation8], 4294967040  ;;  %vm49_vm0 = vcmask 261120   ;;  %v627_v0 = vmov 0.0   ;;  %v488_v1 = vld [vmem:[#allocation7 + $0x8] sm:$0xff]  ;;  %v487_v2 = vld [vmem:[#allocation7] sm:$0xff] }
   0xd   :  { %50 = vst.msk [vmem:[#allocation2] sm:$0xff] %vm49_vm0, %v627_v0  ;;  %83 = vmatpush.bf16.msra.mxu0 %v488_v1  ;;  %133 = vmatpush.bf16.msra.mxu1 %v488_v1  ;;  %v58_v5 = vld [vmem:[#allocation4] sm:$0xff]   ;;  %s628_s0 = smov 32   ;;  %v164_v46 = vld [vmem:[#allocation4 + $0x8] sm:$0xff]   ;;  %s629_s1 = smov 96  }
   0xe   :  { %51 = vst.msk [vmem:[#allocation3] sm:$0xff] %vm49_vm0, %v627_v0  ;;  %179 = vmatpush.bf16.msra.mxu2 %v488_v1  ;;  %225 = vmatpush.bf16.msra.mxu3 %v488_v1  ;;  %v59_v6 = vunpack.c.l.bf16 %v58_v5  ;;  %v119_v27 = vunpack.c.h.bf16 %v58_v5  ;;  %v165_v47 = vunpack.c.l.bf16 %v164_v46  ;;  %s630_s21 = smov [#allocation9]   ;;  %s460_s25 = sshll.u32 %s707_s2, 4  ;;  %s461_s25 = int_to_ptr.hbm [resolvable:$true] %s460_s25 }
   0xf   :  { %s458_s22 = sshll.u32 %s630_s21, 4  ;;  %s459_s22 = int_to_ptr.vmem [resolvable:$true] %s458_s22 }
  0x11   :  { %84 = vmatpush.bf16.msra.mxu0 %v487_v2  ;;  %134 = vmatpush.bf16.msra.mxu1 %v487_v2 }
  0x12   :  { %180 = vmatpush.bf16.msra.mxu2 %v487_v2  ;;  %226 = vmatpush.bf16.msra.mxu3 %v487_v2 }
  0x14   :  { %v56_v3 = vld [vmem:[#allocation2] sm:$0xff] }
  0x15   :  { %v60_v4 = vpack.c.bf16 %v56_v3, %v56_v3  ;;  %271 = vmatpush.bf16.msrb.mxu0 %v488_v1  ;;  %317 = vmatpush.bf16.msrb.mxu1 %v488_v1  ;;  %v57_v11 = vld [vmem:[#allocation3] sm:$0xff] }
  0x16   :  { %363 = vmatpush.bf16.msrb.mxu2 %v488_v1  ;;  %409 = vmatpush.bf16.msrb.mxu3 %v488_v1 }
  0x17   :  { %479 = vmatmul.msk.bf16.vlgmr.msra.gmra.mxu0 %vm49_vm0, %v60_v4 }
  0x19   :  { %272 = vmatpush.bf16.msrb.mxu0 %v487_v2  ;;  %318 = vmatpush.bf16.msrb.mxu1 %v487_v2 }
  0x1a   :  { %364 = vmatpush.bf16.msrb.mxu2 %v487_v2  ;;  %410 = vmatpush.bf16.msrb.mxu3 %v487_v2  ;;  %v211_v2 = vunpack.c.h.bf16 %v164_v46 }
  0x94   :  { %v86_v7 = vpop.f32.mrf.mxu0 }
  0x95   :  { %v90_v8 = vadd.f32 %v86_v7, %v59_v6 }
  0x97   :  { %497 = vtanh.f32 %v90_v8  ;;  %v91_v12 = vmul.f32 0.5, %v90_v8 }
  0x99   :  { %499 = vtanh.f32 %v91_v12 }
  0x9c   :  { %v88_v9 = vpop.f32.mrf.mxu0 }
  0x9d   :  { %v498_v10 = vpop.eup %497 }
  0x9e   :  { %102 = vrot.lane.b32.xlu0 %v498_v10, %s624_s17 }
  0x9f   :  { %v500_v13 = vpop.eup %499 }
  0xa0   :  { %v93_v14 = vmul.f32 0.5, %v500_v13 }
  0xa2   :  { %v94_v15 = vadd.f32 0.5, %v93_v14 }
  0xa6   :  { %97 = vrot.lane.b32.xlu0 %v57_v11, %s628_s0 }
 0x110   :  { %v103_v16 = vpop.permute.xlu0 %102 }
 0x111   :  { %v105_v17 = vmul.f32 %v103_v16, %v94_v15 }
 0x113   :  { %107 = vrot.lane.b32.xlu1 %v105_v17, %s628_s0 }
 0x118   :  { %v98_v18 = vpop.permute.xlu0 %97 }
 0x119   :  { %v100_v19 = vmul.f32 %v98_v18, %v94_v15 }
 0x185   :  { %v108_v20 = vpop.permute.xlu1 %107 }
 0x186   :  { %v110_v21 = vadd.f32 %v108_v20, %v100_v19 }
 0x188   :  { %501 = vtanh.f32 %v110_v21 }
 0x18e   :  { %v502_v22 = vpop.eup %501 }
 0x18f   :  { %113 = vrot.lane.b32.xlu1 %v502_v22, %s624_s17 }
 0x201   :  { %v114_v23 = vpop.permute.xlu1 %113 }
 0x202   :  { %v116_v24 = vmul.f32 %v114_v23, %v94_v15 }
 0x204   :  { %v120_v25 = vpack.c.bf16 %v116_v24, %v116_v24 }
 0x206   :  { %122 = vrot.lane.b32.xlu2 %v120_v25, %s628_s0 }
 0x260   :  { %v123_v26 = vpop.permute.xlu2 %122 }
 0x261   :  { %480 = vmatmul.msk.bf16.vlgmr.msra.gmra.mxu1 %vm49_vm0, %v123_v26 }
 0x2de   :  { %v136_v28 = vpop.f32.mrf.mxu1 }
 0x2df   :  { %v140_v29 = vadd.f32 %v136_v28, %v119_v27 }
 0x2e1   :  { %503 = vtanh.f32 %v140_v29  ;;  %v141_v32 = vmul.f32 0.5, %v140_v29 }
 0x2e3   :  { %505 = vtanh.f32 %v141_v32 }
 0x2e6   :  { %v138_v30 = vpop.f32.mrf.mxu1 }
 0x2e7   :  { %v504_v31 = vpop.eup %503 }
 0x2e8   :  { %148 = vrot.lane.b32.xlu2 %v504_v31, %s624_s17 }
 0x2e9   :  { %v506_v33 = vpop.eup %505 }
 0x2ea   :  { %v143_v34 = vmul.f32 0.5, %v506_v33 }
 0x2ec   :  { %v144_v35 = vadd.f32 0.5, %v143_v34 }
 0x2ee   :  { %v146_v38 = vmul.f32 %v144_v35, %v110_v21  ;;  %v256_v21 = vld [vmem:[#allocation4 + $0x10] sm:$0xff]  }
 0x2ef   :  { %v257_v22 = vunpack.c.l.bf16 %v256_v21 }
 0x342   :  { %v149_v36 = vpop.permute.xlu2 %148 }
 0x343   :  { %v151_v37 = vmul.f32 %v149_v36, %v144_v35 }
 0x345   :  { %153 = vrot.lane.b32.xlu0 %v151_v37, %s628_s0 }
 0x3b7   :  { %v154_v39 = vpop.permute.xlu0 %153 }
 0x3b8   :  { %v156_v40 = vadd.f32 %v154_v39, %v146_v38 }
 0x3ba   :  { %507 = vtanh.f32 %v156_v40 }
 0x3c0   :  { %v508_v41 = vpop.eup %507 }
 0x3c1   :  { %159 = vrot.lane.b32.xlu1 %v508_v41, %s624_s17  ;;  %v303_v41 = vunpack.c.h.bf16 %v256_v21 }
 0x433   :  { %v160_v42 = vpop.permute.xlu1 %159 }
 0x434   :  { %v162_v43 = vmul.f32 %v160_v42, %v144_v35 }
 0x436   :  { %v166_v44 = vpack.c.bf16 %v162_v43, %v162_v43 }
 0x438   :  { %168 = vrot.lane.b32.xlu2 %v166_v44, %s628_s0 }
 0x492   :  { %v169_v45 = vpop.permute.xlu2 %168 }
 0x493   :  { %481 = vmatmul.msk.bf16.vlgmr.msra.gmra.mxu2 %vm49_vm0, %v169_v45 }
 0x516   :  { %v182_v48 = vpop.f32.mrf.mxu2 }
 0x517   :  { %v186_v49 = vadd.f32 %v182_v48, %v165_v47 }
 0x519   :  { %509 = vtanh.f32 %v186_v49  ;;  %v187_v52 = vmul.f32 0.5, %v186_v49 }
 0x51b   :  { %511 = vtanh.f32 %v187_v52 }
 0x51e   :  { %v184_v50 = vpop.f32.mrf.mxu2 }
 0x51f   :  { %v510_v51 = vpop.eup %509 }
 0x520   :  { %194 = vrot.lane.b32.xlu0 %v510_v51, %s624_s17 }
 0x521   :  { %v512_v53 = vpop.eup %511 }
 0x522   :  { %v189_v54 = vmul.f32 0.5, %v512_v53 }
 0x524   :  { %v190_v55 = vadd.f32 0.5, %v189_v54 }
 0x526   :  { %v192_v58 = vmul.f32 %v190_v55, %v156_v40 }
 0x592   :  { %v195_v56 = vpop.permute.xlu0 %194 }
 0x593   :  { %v197_v57 = vmul.f32 %v195_v56, %v190_v55 }
 0x595   :  { %199 = vrot.lane.b32.xlu1 %v197_v57, %s628_s0 }
 0x607   :  { %v200_v59 = vpop.permute.xlu1 %199 }
 0x608   :  { %v202_v60 = vadd.f32 %v200_v59, %v192_v58 }
 0x60a   :  { %513 = vtanh.f32 %v202_v60 }
 0x610   :  { %v514_v61 = vpop.eup %513 }
 0x611   :  { %205 = vrot.lane.b32.xlu2 %v514_v61, %s624_s17 }
 0x66b   :  { %v206_v62 = vpop.permute.xlu2 %205 }
 0x66c   :  { %v208_v63 = vmul.f32 %v206_v62, %v190_v55 }
 0x66e   :  { %v212_v0 = vpack.c.bf16 %v208_v63, %v208_v63 }
 0x670   :  { %214 = vrot.lane.b32.xlu0 %v212_v0, %s628_s0 }
 0x6e2   :  { %v215_v1 = vpop.permute.xlu0 %214 }
 0x6e3   :  { %482 = vmatmul.msk.bf16.vlgmr.msra.gmra.mxu3 %vm49_vm0, %v215_v1 }
 0x766   :  { %v228_v3 = vpop.f32.mrf.mxu3 }
 0x767   :  { %v232_v4 = vadd.f32 %v228_v3, %v211_v2 }
 0x769   :  { %515 = vtanh.f32 %v232_v4  ;;  %v233_v7 = vmul.f32 0.5, %v232_v4 }
 0x76b   :  { %517 = vtanh.f32 %v233_v7 }
 0x76e   :  { %v230_v5 = vpop.f32.mrf.mxu3 }
 0x76f   :  { %v516_v6 = vpop.eup %515 }
 0x770   :  { %240 = vrot.lane.b32.xlu1 %v516_v6, %s624_s17 }
 0x771   :  { %v518_v8 = vpop.eup %517 }
 0x772   :  { %v235_v9 = vmul.f32 0.5, %v518_v8 }
 0x774   :  { %v236_v10 = vadd.f32 0.5, %v235_v9 }
 0x776   :  { %v238_v13 = vmul.f32 %v236_v10, %v202_v60  ;;  %v348_v60 = vld [vmem:[#allocation4 + $0x18] sm:$0xff]  }
 0x777   :  { %v349_v61 = vunpack.c.l.bf16 %v348_v60 }
 0x7e2   :  { %v241_v11 = vpop.permute.xlu1 %240 }
 0x7e3   :  { %v243_v12 = vmul.f32 %v241_v11, %v236_v10 }
 0x7e5   :  { %245 = vrot.lane.b32.xlu2 %v243_v12, %s628_s0 }
 0x83f   :  { %v246_v14 = vpop.permute.xlu2 %245 }
 0x840   :  { %v248_v15 = vadd.f32 %v246_v14, %v238_v13 }
 0x842   :  { %519 = vtanh.f32 %v248_v15 }
 0x848   :  { %v520_v16 = vpop.eup %519 }
 0x849   :  { %251 = vrot.lane.b32.xlu0 %v520_v16, %s624_s17  ;;  %v395_v16 = vunpack.c.h.bf16 %v348_v60 }
 0x8bb   :  { %v252_v17 = vpop.permute.xlu0 %251 }
 0x8bc   :  { %v254_v18 = vmul.f32 %v252_v17, %v236_v10 }
 0x8be   :  { %v258_v19 = vpack.c.bf16 %v254_v18, %v254_v18 }
 0x8c0   :  { %260 = vrot.lane.b32.xlu1 %v258_v19, %s628_s0 }
 0x932   :  { %v261_v20 = vpop.permute.xlu1 %260 }
 0x933   :  { %483 = vmatmul.msk.bf16.vlgmr.msrb.gmra.mxu0 %vm49_vm0, %v261_v20 }
 0x9b0   :  { %v274_v23 = vpop.f32.mrf.mxu0 }
 0x9b1   :  { %v278_v24 = vadd.f32 %v274_v23, %v257_v22 }
 0x9b3   :  { %521 = vtanh.f32 %v278_v24  ;;  %v279_v27 = vmul.f32 0.5, %v278_v24 }
 0x9b5   :  { %523 = vtanh.f32 %v279_v27 }
 0x9b8   :  { %v276_v25 = vpop.f32.mrf.mxu0 }
 0x9b9   :  { %v522_v26 = vpop.eup %521 }
 0x9ba   :  { %286 = vrot.lane.b32.xlu2 %v522_v26, %s624_s17 }
 0x9bb   :  { %v524_v28 = vpop.eup %523 }
 0x9bc   :  { %v281_v29 = vmul.f32 0.5, %v524_v28 }
 0x9be   :  { %v282_v30 = vadd.f32 0.5, %v281_v29 }
 0x9c0   :  { %v284_v33 = vmul.f32 %v282_v30, %v248_v15 }
 0xa14   :  { %v287_v31 = vpop.permute.xlu2 %286 }
 0xa15   :  { %v289_v32 = vmul.f32 %v287_v31, %v282_v30 }
 0xa17   :  { %291 = vrot.lane.b32.xlu0 %v289_v32, %s628_s0 }
 0xa89   :  { %v292_v34 = vpop.permute.xlu0 %291 }
 0xa8a   :  { %v294_v35 = vadd.f32 %v292_v34, %v284_v33 }
 0xa8c   :  { %525 = vtanh.f32 %v294_v35 }
 0xa92   :  { %v526_v36 = vpop.eup %525 }
 0xa93   :  { %297 = vrot.lane.b32.xlu1 %v526_v36, %s624_s17 }
 0xb05   :  { %v298_v37 = vpop.permute.xlu1 %297 }
 0xb06   :  { %v300_v38 = vmul.f32 %v298_v37, %v282_v30 }
 0xb08   :  { %v304_v39 = vpack.c.bf16 %v300_v38, %v300_v38 }
 0xb0a   :  { %306 = vrot.lane.b32.xlu2 %v304_v39, %s628_s0 }
 0xb64   :  { %v307_v40 = vpop.permute.xlu2 %306 }
 0xb65   :  { %484 = vmatmul.msk.bf16.vlgmr.msrb.gmra.mxu1 %vm49_vm0, %v307_v40 }
 0xbe2   :  { %v320_v42 = vpop.f32.mrf.mxu1 }
 0xbe3   :  { %v324_v43 = vadd.f32 %v320_v42, %v303_v41 }
 0xbe5   :  { %527 = vtanh.f32 %v324_v43  ;;  %v325_v46 = vmul.f32 0.5, %v324_v43 }
 0xbe7   :  { %529 = vtanh.f32 %v325_v46 }
 0xbea   :  { %v322_v44 = vpop.f32.mrf.mxu1 }
 0xbeb   :  { %v528_v45 = vpop.eup %527 }
 0xbec   :  { %332 = vrot.lane.b32.xlu0 %v528_v45, %s624_s17 }
 0xbed   :  { %v530_v47 = vpop.eup %529 }
 0xbee   :  { %v327_v48 = vmul.f32 0.5, %v530_v47 }
 0xbf0   :  { %v328_v49 = vadd.f32 0.5, %v327_v48 }
 0xbf2   :  { %v330_v52 = vmul.f32 %v328_v49, %v294_v35 }
 0xc5e   :  { %v333_v50 = vpop.permute.xlu0 %332 }
 0xc5f   :  { %v335_v51 = vmul.f32 %v333_v50, %v328_v49 }
 0xc61   :  { %337 = vrot.lane.b32.xlu1 %v335_v51, %s628_s0 }
 0xcd3   :  { %v338_v53 = vpop.permute.xlu1 %337 }
 0xcd4   :  { %v340_v54 = vadd.f32 %v338_v53, %v330_v52 }
 0xcd6   :  { %531 = vtanh.f32 %v340_v54 }
 0xcdc   :  { %v532_v55 = vpop.eup %531 }
 0xcdd   :  { %343 = vrot.lane.b32.xlu2 %v532_v55, %s624_s17 }
 0xd37   :  { %v344_v56 = vpop.permute.xlu2 %343 }
 0xd38   :  { %v346_v57 = vmul.f32 %v344_v56, %v328_v49 }
 0xd3a   :  { %v350_v58 = vpack.c.bf16 %v346_v57, %v346_v57 }
 0xd3c   :  { %352 = vrot.lane.b32.xlu0 %v350_v58, %s628_s0 }
 0xdae   :  { %v353_v59 = vpop.permute.xlu0 %352 }
 0xdaf   :  { %485 = vmatmul.msk.bf16.vlgmr.msrb.gmra.mxu2 %vm49_vm0, %v353_v59 }
 0xe32   :  { %v366_v62 = vpop.f32.mrf.mxu2 }
 0xe33   :  { %v370_v63 = vadd.f32 %v366_v62, %v349_v61 }
 0xe35   :  { %533 = vtanh.f32 %v370_v63  ;;  %v371_v2 = vmul.f32 0.5, %v370_v63 }
 0xe37   :  { %535 = vtanh.f32 %v371_v2 }
 0xe3a   :  { %v368_v0 = vpop.f32.mrf.mxu2 }
 0xe3b   :  { %v534_v1 = vpop.eup %533 }
 0xe3c   :  { %378 = vrot.lane.b32.xlu1 %v534_v1, %s624_s17 }
 0xe3d   :  { %v536_v3 = vpop.eup %535 }
 0xe3e   :  { %v373_v4 = vmul.f32 0.5, %v536_v3 }
 0xe40   :  { %v374_v5 = vadd.f32 0.5, %v373_v4 }
 0xe42   :  { %v376_v8 = vmul.f32 %v374_v5, %v340_v54 }
 0xeae   :  { %v379_v6 = vpop.permute.xlu1 %378 }
 0xeaf   :  { %v381_v7 = vmul.f32 %v379_v6, %v374_v5 }
 0xeb1   :  { %383 = vrot.lane.b32.xlu2 %v381_v7, %s628_s0 }
 0xf0b   :  { %v384_v9 = vpop.permute.xlu2 %383 }
 0xf0c   :  { %v386_v10 = vadd.f32 %v384_v9, %v376_v8 }
 0xf0e   :  { %537 = vtanh.f32 %v386_v10 }
 0xf14   :  { %v538_v11 = vpop.eup %537 }
 0xf15   :  { %389 = vrot.lane.b32.xlu0 %v538_v11, %s624_s17 }
 0xf87   :  { %v390_v12 = vpop.permute.xlu0 %389 }
 0xf88   :  { %v392_v13 = vmul.f32 %v390_v12, %v374_v5 }
 0xf8a   :  { %v396_v14 = vpack.c.bf16 %v392_v13, %v392_v13 }
 0xf8c   :  { %398 = vrot.lane.b32.xlu1 %v396_v14, %s628_s0 }
 0xffe   :  { %v399_v15 = vpop.permute.xlu1 %398 }
 0xfff   :  { %486 = vmatmul.msk.bf16.vlgmr.msrb.gmra.mxu3 %vm49_vm0, %v399_v15 }
0x1082   :  { %v412_v17 = vpop.f32.mrf.mxu3 }
0x1083   :  { %v416_v18 = vadd.f32 %v412_v17, %v395_v16 }
0x1085   :  { %539 = vtanh.f32 %v416_v18  ;;  %v417_v21 = vmul.f32 0.5, %v416_v18 }
0x1087   :  { %541 = vtanh.f32 %v417_v21 }
0x108a   :  { %v414_v19 = vpop.f32.mrf.mxu3 }
0x108b   :  { %v540_v20 = vpop.eup %539 }
0x108c   :  { %424 = vrot.lane.b32.xlu2 %v540_v20, %s624_s17 }
0x108d   :  { %v542_v22 = vpop.eup %541 }
0x108e   :  { %v419_v23 = vmul.f32 0.5, %v542_v22 }
0x1090   :  { %v420_v24 = vadd.f32 0.5, %v419_v23 }
0x1092   :  { %v422_v27 = vmul.f32 %v420_v24, %v386_v10 }
0x10e6   :  { %v425_v25 = vpop.permute.xlu2 %424 }
0x10e7   :  { %v427_v26 = vmul.f32 %v425_v25, %v420_v24 }
0x10e9   :  { %429 = vrot.lane.b32.xlu0 %v427_v26, %s628_s0 }
0x115b   :  { %v430_v28 = vpop.permute.xlu0 %429 }
0x115c   :  { %v432_v29 = vadd.f32 %v430_v28, %v422_v27 }
0x115e   :  { %543 = vtanh.f32 %v432_v29  ;;  %445 = vrot.lane.b32.xlu0 %v432_v29, %s629_s1 }
0x1164   :  { %v544_v30 = vpop.eup %543 }
0x1165   :  { %435 = vrot.lane.b32.xlu1 %v544_v30, %s624_s17 }
0x11d0   :  { %v446_v31 = vpop.permute.xlu0 %445 }
0x11d1   :  { %448 = vst.msk [vmem:[#allocation3] sm:$0xff] %vm49_vm0, %v446_v31 }
0x11d7   :  { %v436_v32 = vpop.permute.xlu1 %435 }
0x11d8   :  { %v438_v33 = vmul.f32 %v436_v32, %v420_v24 }
0x11da   :  { %440 = vrot.lane.b32.xlu2 %v438_v33, %s628_s0 }
0x1234   :  { %v441_v34 = vpop.permute.xlu2 %440 }
0x1235   :  { %443 = vst.msk [vmem:[#allocation2] sm:$0xff] %vm49_vm0, %v441_v34 }
0x1236   :  { %452 = vst.msk [vmem:[#allocation9] sm:$0xff] %vm49_vm0, %v441_v34 }
0x1237   :  { %463 = dma.vmem_to_hbm [thread:$0]  %s459_s22, 128, %s461_s25, [#allocation6]  }
0x1238   :  { %621 = dma.done.wait [#allocation6], 128  }
0x1239   :  { %622 = vsyncadd [#allocation6], 4294967168 }
0x123a   :  { %468 = vsyncpa [#allocation5], 1 }
0x123b   :  { %469 = vsyncpa [#allocation8], 1 }
0x123c   :  { %470 = vsyncpa [#allocation6], 1 }

</bundles_post_ra>
